<compile_context>
chip_gen: v5e
topology: v5e:2x2
jax: 0.10.0
libtpu: 0.0.40
codegen_flags: <defaults>
</compile_context>

<pallas_src>
import jax
import jax.numpy as jnp
from jax.experimental import pallas as pl
from jax.experimental.pallas import tpu as pltpu


def _cdiv(a, b):
    return (a + b - 1) // b


def _round_up(x, m):
    return ((x + m - 1) // m) * m


def _tpu_generation_defaults():
    """Return (input_tile_vmem_budget_bytes, vmem_limit_bytes, n_parallel_chunks)."""
    kind = ""
    try:
        kind = jax.devices()[0].device_kind.lower()
    except Exception:
        pass
    if "v5 lite" in kind or "v5lite" in kind or "v5e" in kind:
        # v5e: 16 MiB default scoped VMEM, single TensorCore.
        return 12 * 2**20, 16 * 2**20, 1
    if "v7" in kind or "tpu7" in kind or kind.endswith("7x"):
        # v7x: 64 MiB physical VMEM, 2 TensorCores -> keep scoped use <= ~32 MiB,
        # use an even parallel chunk count so both TCs get work.
        return 20 * 2**20, 32 * 2**20, 2
    if "v6" in kind:
        # v6e: most VMEM headroom, single TensorCore.
        return 24 * 2**20, 32 * 2**20, 1
    # Unknown chip / interpret fallback: conservative budget, 2-way chunking.
    return 12 * 2**20, 32 * 2**20, 2


def _make_partial_sums_kernel(tile, hw, tiles_per_chunk, needs_mask):
    """Kernel: accumulate per-(B, C) partial sums for one parallel chunk.

    grid = (n_chunks [parallel], tiles_per_chunk [arbitrary])
      p_ref, t_ref            : (B, C, tile) input tiles
      tp_ref, ts_ref, ps_ref  : (1, B, C) resident f32 output accumulators
    """

    def kernel(p_ref, t_ref, tp_ref, ts_ref, ps_ref):
        k = pl.program_id(1)

        @pl.when(k == 0)
        def _():
            tp_ref[...] = jnp.zeros_like(tp_ref)
            ts_ref[...] = jnp.zeros_like(ts_ref)
            ps_ref[...] = jnp.zeros_like(ps_ref)

        p = p_ref[...].astype(jnp.float32)
        t = t_ref[...].astype(jnp.float32)

        if needs_mask:
            # Global tile index (unclamped) -> lanes beyond hw are zeroed, so
            # partial last tiles and duplicated (clamped) tiles contribute 0.
            g = pl.program_id(0) * tiles_per_chunk + k
            remaining = hw - g * tile  # may be <= 0 for duplicated tiles
            lane = jax.lax.broadcasted_iota(jnp.int32, p.shape, p.ndim - 1)
            valid = lane < remaining
            p = jnp.where(valid, p, 0.0)
            t = jnp.where(valid, t, 0.0)

        tp_ref[...] += jnp.sum(t * p, axis=-1)[None]
        ts_ref[...] += jnp.sum(t, axis=-1)[None]
        ps_ref[...] += jnp.sum(p, axis=-1)[None]

    return kernel


def jet_loss_pallas(predict, target, *, background_idx=30, eps=1e-6, weight=True,
                    max_tile=None, n_chunks=None, vmem_budget_bytes=None):
    """predict, target: (B, C, H, W) arrays (NCHW, like PyTorch)."""
    B, C, H, W = predict.shape
    assert target.shape == (B, C, H, W), "predict/target shape mismatch"
    if not (0 <= background_idx < C):
        raise ValueError(f"background_idx={background_idx} out of range for C={C}")

    hw = H * W
    p = predict.reshape(B, C, hw)
    t = target.reshape(B, C, hw)

    budget, vmem_limit, default_chunks = _tpu_generation_defaults()
    if vmem_budget_bytes is not None:
        budget = int(vmem_budget_bytes)
    if n_chunks is None:
        n_chunks = default_chunks

    # ---- VMEM-budgeted tile: (2 pipeline buffers) x (both inputs), per-input
    # itemsize (so bf16/int8 inputs get proportionally bigger tiles).
    p_item = jnp.dtype(predict.dtype).itemsize
    t_item = jnp.dtype(target.dtype).itemsize
    bytes_per_lane = B * C * (p_item + t_item)
    cap = budget // (2 * bytes_per_lane)
    cap = max(128, (cap // 128) * 128)
    if max_tile is not None:
        cap = min(cap, max(128, (max_tile // 128) * 128))
    tile = min(cap, _round_up(hw, 128))

    # ---- grid over-covers hw; no wrapper-side padding copy.
    n_tiles = _cdiv(hw, tile)
    n_chunks = max(1, min(int(n_chunks), n_tiles))
    tiles_per_chunk = _cdiv(n_tiles, n_chunks)
    overhang_tiles = n_chunks * tiles_per_chunk != n_tiles
    needs_mask = (hw % tile != 0) or overhang_tiles

    def in_map(i, k):
        g = i * tiles_per_chunk + k
        if overhang_tiles:
            # Never start a DMA fully out of bounds; duplicated reads of the
            # last tile are fully masked to zero inside the kernel.
            g = jnp.minimum(g, n_tiles - 1)
        return (0, 0, g)

    def out_map(i, k):
        return (i, 0, 0)

    out_shape = jax.ShapeDtypeStruct((n_chunks, B, C), jnp.float32)

    bytes_accessed = B * C * hw * (p_item + t_item) + 3 * n_chunks * B * C * 4
    cost = pl.CostEstimate(flops=4 * B * C * hw, transcendentals=0,
                           bytes_accessed=int(bytes_accessed))

    kernel = _make_partial_sums_kernel(tile, hw, tiles_per_chunk, needs_mask)

    tp_p, ts_p, ps_p = pl.pallas_call(
        kernel,
        out_shape=(out_shape, out_shape, out_shape),
        grid_spec=pltpu.PrefetchScalarGridSpec(
            num_scalar_prefetch=0,
            grid=(n_chunks, tiles_per_chunk),
            in_specs=[
                pl.BlockSpec((B, C, tile), in_map),
                pl.BlockSpec((B, C, tile), in_map),
            ],
            out_specs=[
                pl.BlockSpec((1, B, C), out_map),
                pl.BlockSpec((1, B, C), out_map),
                pl.BlockSpec((1, B, C), out_map),
            ],
        ),
        compiler_params=pltpu.CompilerParams(
            dimension_semantics=("parallel", "arbitrary"),
            vmem_limit_bytes=int(vmem_limit),
        ),
        cost_estimate=cost,
    )(p, t)

    # ---- finalize in plain JAX (O(B*C), mirrors PyTorch op order exactly)
    tp = jnp.sum(tp_p, axis=0)   # (B, C) sum(target * predict) over H, W
    ts = jnp.sum(ts_p, axis=0)   # (B, C) sum(target)           over H, W
    ps = jnp.sum(ps_p, axis=0)   # (B, C) sum(predict)          over H, W

    # recall
    fn = ts - tp
    tp_r = tp + eps
    fn_r = fn + eps
    recall = jnp.maximum(jnp.mean((tp_r + eps) / (fn_r + tp_r + eps)), 0.0)

    # precision
    fp = ps - tp
    tp_pc = tp + eps
    fp_pc = fp + eps
    precision = jnp.maximum(
        jnp.mean((tp_pc + eps) / (tp_pc + fp_pc + eps)) * 100.0, 0.0)

    # class weights
    if weight:
        cw = ts / jnp.sum(ts)
        cw = cw.at[:, background_idx].set(0.0)
        weights = jnp.mean(cw)
    else:
        weights = jnp.float32(1.0)

    # background-class IoU
    inter = tp[:, background_idx]
    union = ts[:, background_idx] + ps[:, background_idx] - inter
    ioub = jnp.maximum(jnp.mean((inter + eps) / (union + eps)) * 10.0, 0.0)

    loss = (recall * weights + precision * weights + ioub * weights) * 10.0
    return jnp.maximum(loss, 0.0)
    # TODO(synk): torch's .cuda() / .requires_grad_() / debug prints are
    # framework bookkeeping with no Pallas equivalent; intentionally omitted.


def jet_loss_reference(predict, target, *, background_idx=30, eps=1e-6):
    """Pure-JAX replica of the PyTorch forward for validation."""
    t = target.astype(jnp.float32)
    p = predict.astype(jnp.float32)

    # recall
    tp = jnp.sum(t * p, axis=(2, 3))
    tot = jnp.sum(t, axis=(2, 3))
    fn = tot - tp
    tp1, fn1 = tp + eps, fn + eps
    recall = jnp.maximum(jnp.mean((tp1 + eps) / (fn1 + tp1 + eps)), 0.0)

    # precision
    tp = jnp.sum(t * p, axis=(2, 3))
    tot = jnp.sum(p, axis=(2, 3))
    fp = tot - tp
    tp1, fp1 = tp + eps, fp + eps
    precision = jnp.maximum(jnp.mean((tp1 + eps) / (tp1 + fp1 + eps)) * 100.0, 0.0)

    # class weights
    total_pixels = jnp.sum(t, axis=(2, 3))
    cw = total_pixels / jnp.sum(total_pixels)
    cw = cw.at[:, background_idx].set(0.0)
    weights = jnp.mean(cw)

    # background IoU
    bm = t[:, background_idx]
    pbm = p[:, background_idx]
    inter = jnp.sum(bm * pbm, axis=(1, 2))
    union = jnp.sum(bm + pbm, axis=(1, 2)) - inter
    ioub = jnp.maximum(jnp.mean((inter + eps) / (union + eps)) * 10.0, 0.0)

    loss = (recall * weights + precision * weights + ioub * weights) * 10.0
    return jnp.maximum(loss, 0.0)


if __name__ == "__main__":
    key = jax.random.PRNGKey(0)

    # Case 1: canonical small shape (n_classes=32, background_idx=30), single tile.
    B, C, H, W = 2, 32, 16, 16
    kp, kt, key = jax.random.split(key, 3)
    predict = jax.nn.softmax(jax.random.normal(kp, (B, C, H, W), jnp.float32), axis=1)
    target = (jax.random.uniform(kt, (B, C, H, W), jnp.float32) > 0.5).astype(jnp.float32)

    loss = jax.block_until_ready(jet_loss_pallas(predict, target))
    ref = jax.block_until_ready(jet_loss_reference(predict, target))
    assert jnp.isfinite(loss), "kernel produced non-finite loss (case 1)"
    assert jnp.allclose(loss, ref, rtol=1e-4, atol=1e-4), (loss, ref)

    # Case 2: multi-tile + partial last tile (mask path) + 2 parallel chunks,
    # mixed dtype (bf16 predict) to exercise narrow-dtype HBM path.
    # hw = 1600, tile = 512 -> 4 tiles, last tile has 64 valid lanes of 512.
    B, C, H, W = 2, 32, 40, 40
    kp, kt, key = jax.random.split(key, 3)
    predict2 = jax.nn.softmax(
        jax.random.normal(kp, (B, C, H, W), jnp.float32), axis=1).astype(jnp.bfloat16)
    target2 = (jax.random.uniform(kt, (B, C, H, W), jnp.float32) > 0.5).astype(jnp.float32)

    loss2 = jax.block_until_ready(
        jet_loss_pallas(predict2, target2, max_tile=512, n_chunks=2))
    ref2 = jax.block_until_ready(jet_loss_reference(predict2, target2))
    assert jnp.isfinite(loss2), "kernel produced non-finite loss (case 2)"
    assert jnp.allclose(loss2, ref2, rtol=1e-4, atol=1e-4), (loss2, ref2)

    # Case 3: odd tile count (3) with 2 chunks -> exercises the clamped
    # duplicate-tile path (fully-masked overhang tile) plus the partial tile.
    B, C, H, W = 2, 32, 38, 38
    kp, kt, key = jax.random.split(key, 3)
    predict3 = jax.nn.softmax(jax.random.normal(kp, (B, C, H, W), jnp.float32), axis=1)
    target3 = (jax.random.uniform(kt, (B, C, H, W), jnp.float32) > 0.5).astype(jnp.float32)

    loss3 = jax.block_until_ready(
        jet_loss_pallas(predict3, target3, max_tile=512, n_chunks=2))
    ref3 = jax.block_until_ready(jet_loss_reference(predict3, target3))
    assert jnp.isfinite(loss3), "kernel produced non-finite loss (case 3)"
    assert jnp.allclose(loss3, ref3, rtol=1e-4, atol=1e-4), (loss3, ref3)

    print("KERNEL_OK")
</pallas_src>

<mosaic_0001>
module attributes {stable_mosaic.version = 11 : i64} {
  func.func @kernel(%arg0: i32, %arg1: i32, %arg2: memref<2x32x256xf32, #tpu.memory_space<vmem>>, %arg3: memref<2x32x256xf32, #tpu.memory_space<vmem>>, %arg4: memref<1x2x32xf32, #tpu.memory_space<vmem>>, %arg5: memref<1x2x32xf32, #tpu.memory_space<vmem>>, %arg6: memref<1x2x32xf32, #tpu.memory_space<vmem>>) attributes {dimension_semantics = [#tpu.dimension_semantics<parallel>, #tpu.dimension_semantics<arbitrary>], iteration_bounds = array<i64: 1, 1>, scalar_prefetch = 0 : i64, scratch_operands = 0 : i64, tpu.core_type = #tpu.core_type<tc>, window_params = [{transform_indices = @transform_0, window_bounds = array<i64: 2, 32, 256>}, {transform_indices = @transform_1, window_bounds = array<i64: 2, 32, 256>}, {transform_indices = @transform_2, window_bounds = array<i64: 1, 2, 32>}, {transform_indices = @transform_3, window_bounds = array<i64: 1, 2, 32>}, {transform_indices = @transform_4, window_bounds = array<i64: 1, 2, 32>}]} {
    %c0_i32 = arith.constant 0 : i32
    %0 = arith.cmpi eq, %arg1, %c0_i32 : i32
    %1 = arith.extui %0 : i1 to i32
    %c0_i32_0 = arith.constant 0 : i32
    %2 = arith.cmpi ne, %1, %c0_i32_0 : i32
    scf.if %2 {
      %cst_26 = arith.constant 0.000000e+00 : f32
      %21 = vector.broadcast %cst_26 : f32 to vector<1x2x32xf32>
      %c0_27 = arith.constant 0 : index
      %c0_28 = arith.constant 0 : index
      %c0_29 = arith.constant 0 : index
      %22 = vector.load %arg4[%c0_27, %c0_28, %c0_29] : memref<1x2x32xf32, #tpu.memory_space<vmem>>, vector<1x2x32xf32>
      tpu.vector_store %arg4[%c0_27, %c0_28, %c0_29], %21 {strides = array<i32>} : memref<1x2x32xf32, #tpu.memory_space<vmem>>, vector<1x2x32xf32>,
      %cst_30 = arith.constant 0.000000e+00 : f32
      %23 = vector.broadcast %cst_30 : f32 to vector<1x2x32xf32>
      %c0_31 = arith.constant 0 : index
      %c0_32 = arith.constant 0 : index
      %c0_33 = arith.constant 0 : index
      %24 = vector.load %arg5[%c0_31, %c0_32, %c0_33] : memref<1x2x32xf32, #tpu.memory_space<vmem>>, vector<1x2x32xf32>
      tpu.vector_store %arg5[%c0_31, %c0_32, %c0_33], %23 {strides = array<i32>} : memref<1x2x32xf32, #tpu.memory_space<vmem>>, vector<1x2x32xf32>,
      %cst_34 = arith.constant 0.000000e+00 : f32
      %25 = vector.broadcast %cst_34 : f32 to vector<1x2x32xf32>
      %c0_35 = arith.constant 0 : index
      %c0_36 = arith.constant 0 : index
      %c0_37 = arith.constant 0 : index
      %26 = vector.load %arg6[%c0_35, %c0_36, %c0_37] : memref<1x2x32xf32, #tpu.memory_space<vmem>>, vector<1x2x32xf32>
      tpu.vector_store %arg6[%c0_35, %c0_36, %c0_37], %25 {strides = array<i32>} : memref<1x2x32xf32, #tpu.memory_space<vmem>>, vector<1x2x32xf32>,
    } else {
    }
    %c0 = arith.constant 0 : index
    %c0_1 = arith.constant 0 : index
    %c0_2 = arith.constant 0 : index
    %3 = vector.load %arg2[%c0, %c0_1, %c0_2] : memref<2x32x256xf32, #tpu.memory_space<vmem>>, vector<2x32x256xf32>
    %c0_3 = arith.constant 0 : index
    %c0_4 = arith.constant 0 : index
    %c0_5 = arith.constant 0 : index
    %4 = vector.load %arg3[%c0_3, %c0_4, %c0_5] : memref<2x32x256xf32, #tpu.memory_space<vmem>>, vector<2x32x256xf32>
    %c0_6 = arith.constant 0 : index
    %c0_7 = arith.constant 0 : index
    %c0_8 = arith.constant 0 : index
    %5 = vector.load %arg4[%c0_6, %c0_7, %c0_8] : memref<1x2x32xf32, #tpu.memory_space<vmem>>, vector<1x2x32xf32>
    %6 = arith.mulf %4, %3 : vector<2x32x256xf32>
    %cst = arith.constant dense<0.000000e+00> : vector<2x32xf32>
    %7 = vector.multi_reduction <add>, %6, %cst [2] : vector<2x32x256xf32> to vector<2x32xf32>
    %8 = vector.shape_cast %7 : vector<2x32xf32> to vector<1x2x32xf32>
    %9 = arith.addf %5, %8 : vector<1x2x32xf32>
    %c0_9 = arith.constant 0 : index
    %c0_10 = arith.constant 0 : index
    %c0_11 = arith.constant 0 : index
    %10 = vector.load %arg4[%c0_9, %c0_10, %c0_11] : memref<1x2x32xf32, #tpu.memory_space<vmem>>, vector<1x2x32xf32>
    tpu.vector_store %arg4[%c0_9, %c0_10, %c0_11], %9 {strides = array<i32>} : memref<1x2x32xf32, #tpu.memory_space<vmem>>, vector<1x2x32xf32>,
    %c0_12 = arith.constant 0 : index
    %c0_13 = arith.constant 0 : index
    %c0_14 = arith.constant 0 : index
    %11 = vector.load %arg5[%c0_12, %c0_13, %c0_14] : memref<1x2x32xf32, #tpu.memory_space<vmem>>, vector<1x2x32xf32>
    %cst_15 = arith.constant dense<0.000000e+00> : vector<2x32xf32>
    %12 = vector.multi_reduction <add>, %4, %cst_15 [2] : vector<2x32x256xf32> to vector<2x32xf32>
    %13 = vector.shape_cast %12 : vector<2x32xf32> to vector<1x2x32xf32>
    %14 = arith.addf %11, %13 : vector<1x2x32xf32>
    %c0_16 = arith.constant 0 : index
    %c0_17 = arith.constant 0 : index
    %c0_18 = arith.constant 0 : index
    %15 = vector.load %arg5[%c0_16, %c0_17, %c0_18] : memref<1x2x32xf32, #tpu.memory_space<vmem>>, vector<1x2x32xf32>
    tpu.vector_store %arg5[%c0_16, %c0_17, %c0_18], %14 {strides = array<i32>} : memref<1x2x32xf32, #tpu.memory_space<vmem>>, vector<1x2x32xf32>,
    %c0_19 = arith.constant 0 : index
    %c0_20 = arith.constant 0 : index
    %c0_21 = arith.constant 0 : index
    %16 = vector.load %arg6[%c0_19, %c0_20, %c0_21] : memref<1x2x32xf32, #tpu.memory_space<vmem>>, vector<1x2x32xf32>
    %cst_22 = arith.constant dense<0.000000e+00> : vector<2x32xf32>
    %17 = vector.multi_reduction <add>, %3, %cst_22 [2] : vector<2x32x256xf32> to vector<2x32xf32>
    %18 = vector.shape_cast %17 : vector<2x32xf32> to vector<1x2x32xf32>
    %19 = arith.addf %16, %18 : vector<1x2x32xf32>
    %c0_23 = arith.constant 0 : index
    %c0_24 = arith.constant 0 : index
    %c0_25 = arith.constant 0 : index
    %20 = vector.load %arg6[%c0_23, %c0_24, %c0_25] : memref<1x2x32xf32, #tpu.memory_space<vmem>>, vector<1x2x32xf32>
    tpu.vector_store %arg6[%c0_23, %c0_24, %c0_25], %19 {strides = array<i32>} : memref<1x2x32xf32, #tpu.memory_space<vmem>>, vector<1x2x32xf32>,
    return
  }
  func.func @transform_0(%arg0: i32, %arg1: i32) -> (i32, i32, i32) {
    %c1_i32 = arith.constant 1 : i32
    %0 = arith.muli %arg0, %c1_i32 : i32
    %1 = arith.addi %0, %arg1 : i32
    %c0_i32 = arith.constant 0 : i32
    %c0_i32_0 = arith.constant 0 : i32
    %c0_i32_1 = arith.constant 0 : i32
    return %c0_i32, %c0_i32_0, %1 : i32, i32, i32
  }
  func.func @transform_1(%arg0: i32, %arg1: i32) -> (i32, i32, i32) {
    %c1_i32 = arith.constant 1 : i32
    %0 = arith.muli %arg0, %c1_i32 : i32
    %1 = arith.addi %0, %arg1 : i32
    %c0_i32 = arith.constant 0 : i32
    %c0_i32_0 = arith.constant 0 : i32
    %c0_i32_1 = arith.constant 0 : i32
    return %c0_i32, %c0_i32_0, %1 : i32, i32, i32
  }
  func.func @transform_2(%arg0: i32, %arg1: i32) -> (i32, i32, i32) {
    %c0_i32 = arith.constant 0 : i32
    %c0_i32_0 = arith.constant 0 : i32
    %c0_i32_1 = arith.constant 0 : i32
    return %arg0, %c0_i32, %c0_i32_0 : i32, i32, i32
  }
  func.func @transform_3(%arg0: i32, %arg1: i32) -> (i32, i32, i32) {
    %c0_i32 = arith.constant 0 : i32
    %c0_i32_0 = arith.constant 0 : i32
    %c0_i32_1 = arith.constant 0 : i32
    return %arg0, %c0_i32, %c0_i32_0 : i32, i32, i32
  }
  func.func @transform_4(%arg0: i32, %arg1: i32) -> (i32, i32, i32) {
    %c0_i32 = arith.constant 0 : i32
    %c0_i32_0 = arith.constant 0 : i32
    %c0_i32_1 = arith.constant 0 : i32
    return %arg0, %c0_i32, %c0_i32_0 : i32, i32, i32
  }
}

</mosaic_0001>

<bundles_post_ra>
// kernel: tpu_custom_call.1
= control target key start
LH: loop header
LB: loop body
LE: loop exit
PB: predicated region body
PF: predicated region fallthrough
CT: control target
= control target key end

     0   :  { %10 = vsyncpa [#allocation3], 0  ;;  %s614_s0 = inlined_call_operand.hbm [shape: f32[2,32,256], index: 0, kind: input, shape index: {}]   ;;  %s615_s1 = inlined_call_operand.hbm [shape: f32[2,32,256], index: 1, kind: input, shape index: {}]   ;;  %s616_s2 = inlined_call_operand.hbm [shape: f32[1,2,32], index: 2, kind: output, shape index: {0}]   ;;  %s617_s3 = inlined_call_operand.hbm [shape: f32[1,2,32], index: 3, kind: output, shape index: {1}]   ;;  %s618_s4 = inlined_call_operand.hbm [shape: f32[1,2,32], index: 4, kind: output, shape index: {2}]  }
   0x1   :  { %11 = vsyncpa [#allocation6], 0 }
   0x2   :  { %12 = vsyncpa [#allocation4], 0 }
   0x3   :  { %13 = vsyncpa [#allocation9], 0  ;;  %s22_s17 = sshll.u32 %s614_s0, 4  ;;  %s464_s18 = smov [#allocation2]   ;;  %s23_s17 = int_to_ptr.hbm [resolvable:$true] %s22_s17 }
   0x4   :  { %s24_s19 = sshll.u32 %s464_s18, 4  ;;  %s39_s22 = sshll.u32 %s615_s1, 4  ;;  %s25_s19 = int_to_ptr.vmem [resolvable:$true] %s24_s19  ;;  %s40_s22 = int_to_ptr.hbm [resolvable:$true] %s39_s22 }
   0x5   :  { %s465_s23 = smov 256   ;;  %s466_s24 = smov 16  }
   0x6   :  { %30 = dma.hbm_to_vmem [thread:$0]  %s23_s17, 2048, %s25_s19, [#allocation3], %s465_s23, %s465_s23, %s466_s24  }
   0x7   :  { %s467_s25 = smov [#allocation5]  }
   0x8   :  { %s41_s26 = sshll.u32 %s467_s25, 4  ;;  %s42_s26 = int_to_ptr.vmem [resolvable:$true] %s41_s26 }
   0x9   :  { %47 = dma.hbm_to_vmem [thread:$0]  %s40_s22, 2048, %s42_s26, [#allocation6], %s465_s23, %s465_s23, %s466_s24  }
   0xa   :  { %456 = dma.done.wait [#allocation3], 2048  }
   0xb   :  { %457 = vsyncadd [#allocation3], 4294965248 }
   0xc   :  { %458 = dma.done.wait [#allocation6], 2048  }
   0xd   :  { %459 = vsyncadd [#allocation6], 4294965248  ;;  %v503_v0 = vld [vmem:[#allocation2 + $0x40] sm:$0xff]  ;;  %v505_v1 = vld [vmem:[#allocation2 + $0x48] sm:$0xff]  ;;  %vm64_vm0 = vcmask 254976   ;;  %vm154_vm1 = vcmask 130112  }
   0xe   :  { %v507_v2 = vld [vmem:[#allocation5 + $0x40] sm:$0xff]  ;;  %v509_v3 = vld [vmem:[#allocation5 + $0x48] sm:$0xff]  ;;  %v78_v19 = vld [vmem:[#allocation2 + $0x50] sm:$0xff]  ;;  %vm158_vm2 = vcmask 195712   ;;  %vm162_vm3 = vcmask 261312   ;;  %vm171_vm4 = vcmask 1041409  }
   0xf   :  { %v109_v4 = vmul.f32 %v507_v2, %v503_v0  ;;  %v513_v5 = vld [vmem:[#allocation2 + $0x20] sm:$0xff]  ;;  %v515_v6 = vld [vmem:[#allocation2 + $0x28] sm:$0xff]  ;;  %v110_v7 = vmul.f32 %v509_v3, %v505_v1  ;;  %v79_v20 = vld [vmem:[#allocation2 + $0x58] sm:$0xff]  ;;  %v190_v58 = vadd.f32 %v509_v3, %v507_v2  ;;  %s469_s0 = smov [#allocation7]   ;;  %s286_s29 = sshll.u32 %s616_s2, 4  ;;  %s287_s29 = int_to_ptr.hbm [resolvable:$true] %s286_s29 }
  0x10   :  { %v519_v8 = vld [vmem:[#allocation5 + $0x20] sm:$0xff]  ;;  %v521_v9 = vld [vmem:[#allocation5 + $0x28] sm:$0xff]  ;;  %v94_v21 = vld [vmem:[#allocation5 + $0x50] sm:$0xff]  ;;  %v244_v63 = vadd.f32 %v79_v20, %v78_v19  ;;  %v235_v2 = vadd.f32 %v515_v6, %v513_v5  ;;  %s284_s1 = sshll.u32 %s469_s0, 4  ;;  %s470_s2 = smov [#allocation8]   ;;  %s285_s1 = int_to_ptr.vmem [resolvable:$true] %s284_s1 }
  0x11   :  { %v68_v10 = vld [vmem:[#allocation2] sm:$0xff]  ;;  %v105_v11 = vmul.f32 %v519_v8, %v513_v5  ;;  %v106_v12 = vmul.f32 %v521_v9, %v515_v6  ;;  %v69_v13 = vld [vmem:[#allocation2 + $0x8] sm:$0xff]  ;;  %v129_v16 = vadd.f32 %v110_v7, %v109_v4  ;;  %v95_v23 = vld [vmem:[#allocation5 + $0x58] sm:$0xff]  ;;  %v111_v27 = vmul.f32 %v94_v21, %v78_v19  ;;  %s295_s30 = sshll.u32 %s470_s2, 4  ;;  %s297_s7 = sshll.u32 %s617_s3, 4  ;;  %s296_s30 = int_to_ptr.vmem [resolvable:$true] %s295_s30  ;;  %s298_s7 = int_to_ptr.hbm [resolvable:$true] %s297_s7 }
  0x12   :  { %v84_v14 = vld [vmem:[#allocation5] sm:$0xff]  ;;  %v85_v15 = vld [vmem:[#allocation5 + $0x8] sm:$0xff]  ;;  %v527_v24 = vld [vmem:[#allocation2 + $0x30] sm:$0xff]  ;;  %v112_v28 = vmul.f32 %v95_v23, %v79_v20  ;;  %v193_v57 = vadd.f32 %v95_v23, %v94_v21  ;;  %v229_v60 = vadd.f32 %v69_v13, %v68_v10  ;;  %v184_v62 = vadd.f32 %v521_v9, %v519_v8  ;;  %s471_s3 = smov [#allocation10]   ;;  %s308_s11 = sshll.u32 %s618_s4, 4  ;;  %s309_s11 = int_to_ptr.hbm [resolvable:$true] %s308_s11 }
  0x13   :  { %v101_v17 = vmul.f32 %v84_v14, %v68_v10  ;;  %v102_v18 = vmul.f32 %v85_v15, %v69_v13  ;;  %v123_v22 = vadd.f32 %v106_v12, %v105_v11  ;;  %v529_v25 = vld [vmem:[#allocation2 + $0x38] sm:$0xff]  ;;  %130 = vadd.xlane.f32.xlu2 %v129_v16  ;;  %v90_v29 = vld [vmem:[#allocation5 + $0x30] sm:$0xff]  ;;  %v80_v46 = vld [vmem:[#allocation2 + $0x60] sm:$0xff]  ;;  %v178_v54 = vadd.f32 %v85_v15, %v84_v14  ;;  %s306_s8 = sshll.u32 %s471_s3, 4  ;;  %s307_s8 = int_to_ptr.vmem [resolvable:$true] %s306_s8 }
  0x14   :  { %v91_v30 = vld [vmem:[#allocation5 + $0x38] sm:$0xff]  ;;  %v70_v31 = vld [vmem:[#allocation2 + $0x10] sm:$0xff]  ;;  %v107_v32 = vmul.f32 %v90_v29, %v527_v24  ;;  %v132_v39 = vadd.f32 %v112_v28, %v111_v27  ;;  %v81_v47 = vld [vmem:[#allocation2 + $0x68] sm:$0xff]  ;;  %v241_v4 = vadd.f32 %v505_v1, %v503_v0  ;;  %v238_v9 = vadd.f32 %v529_v25, %v527_v24 }
  0x15   :  { %v117_v26 = vadd.f32 %v102_v18, %v101_v17  ;;  %124 = vadd.xlane.f32.xlu1 %v123_v22  ;;  %v108_v33 = vmul.f32 %v91_v30, %v529_v25  ;;  %v71_v34 = vld [vmem:[#allocation2 + $0x18] sm:$0xff]  ;;  %v86_v35 = vld [vmem:[#allocation5 + $0x10] sm:$0xff]  ;;  %v96_v48 = vld [vmem:[#allocation5 + $0x60] sm:$0xff]  ;;  %v187_v10 = vadd.f32 %v91_v30, %v90_v29  ;;  %v247_v11 = vadd.f32 %v81_v47, %v80_v46 }
  0x16   :  { %v87_v36 = vld [vmem:[#allocation5 + $0x18] sm:$0xff]  ;;  %v103_v37 = vmul.f32 %v86_v35, %v70_v31  ;;  %v82_v41 = vld [vmem:[#allocation2 + $0x70] sm:$0xff]  ;;  %v97_v49 = vld [vmem:[#allocation5 + $0x68] sm:$0xff]  ;;  %v113_v52 = vmul.f32 %v96_v48, %v80_v46  ;;  %v232_v7 = vadd.f32 %v71_v34, %v70_v31  ;;  %v468_v0 = vmov 0.0  }
  0x17   :  { %118 = vadd.xlane.f32.xlu0 %v117_v26  ;;  %v104_v38 = vmul.f32 %v87_v36, %v71_v34  ;;  %v126_v40 = vadd.f32 %v108_v33, %v107_v32  ;;  %v83_v42 = vld [vmem:[#allocation2 + $0x78] sm:$0xff]  ;;  %v98_v44 = vld [vmem:[#allocation5 + $0x70] sm:$0xff]  ;;  %v114_v53 = vmul.f32 %v97_v49, %v81_v47  ;;  %v181_v59 = vadd.f32 %v87_v36, %v86_v35 }
  0x18   :  { %v99_v45 = vld [vmem:[#allocation5 + $0x78] sm:$0xff]  ;;  %v115_v50 = vmul.f32 %v98_v44, %v82_v41  ;;  %v196_v61 = vadd.f32 %v97_v49, %v96_v48  ;;  %v250_v8 = vadd.f32 %v83_v42, %v82_v41  ;;  %66 = vst.msk [vmem:[#allocation8] sm:$0x3] %vm64_vm0, %v468_v0  ;;  %v149_v6 = vlaneseq }
  0x19   :  { %v120_v43 = vadd.f32 %v104_v38, %v103_v37  ;;  %v116_v51 = vmul.f32 %v99_v45, %v83_v42  ;;  %v135_v56 = vadd.f32 %v114_v53, %v113_v52  ;;  %v199_v3 = vadd.f32 %v99_v45, %v98_v44  ;;  %65 = vst.msk [vmem:[#allocation7] sm:$0x3] %vm64_vm0, %v468_v0 }
  0x1a   :  { %67 = vst.msk [vmem:[#allocation10] sm:$0x3] %vm64_vm0, %v468_v0  ;;  %v546_v13 = vand.u32 127, %v149_v6 }
  0x1b   :  { %133 = vadd.xlane.f32.xlu2 %v132_v39  ;;  %v138_v55 = vadd.f32 %v116_v51, %v115_v50 }
  0x1c   :  { %v549_v14 = vadd.s32 4294967288, %v546_v13  ;;  %v553_v19 = vadd.s32 4294967280, %v546_v13  ;;  %v557_v21 = vadd.s32 4294967272, %v546_v13 }
  0x1d   :  { %127 = vadd.xlane.f32.xlu1 %v126_v40 }
  0x1f   :  { %121 = vadd.xlane.f32.xlu0 %v120_v43 }
  0x20   :  { %v100_v35 = vld [vmem:[#allocation7] sm:$0x3] }
  0x23   :  { %179 = vadd.xlane.f32.xlu2 %v178_v54 }
  0x25   :  { %139 = vadd.xlane.f32.xlu1 %v138_v55 }
  0x27   :  { %136 = vadd.xlane.f32.xlu0 %v135_v56 }
  0x2b   :  { %194 = vadd.xlane.f32.xlu2 %v193_v57 }
  0x2d   :  { %191 = vadd.xlane.f32.xlu1 %v190_v58 }
  0x2f   :  { %182 = vadd.xlane.f32.xlu0 %v181_v59 }
  0x33   :  { %230 = vadd.xlane.f32.xlu2 %v229_v60 }
  0x35   :  { %197 = vadd.xlane.f32.xlu1 %v196_v61 }
  0x37   :  { %185 = vadd.xlane.f32.xlu0 %v184_v62 }
  0x3b   :  { %245 = vadd.xlane.f32.xlu2 %v244_v63 }
  0x3d   :  { %242 = vadd.xlane.f32.xlu1 %v241_v4 }
  0x3f   :  { %233 = vadd.xlane.f32.xlu0 %v232_v7  ;;  %v177_v7 = vld [vmem:[#allocation8] sm:$0x3] }
  0x43   :  { %236 = vadd.xlane.f32.xlu2 %v235_v2 }
  0x45   :  { %200 = vadd.xlane.f32.xlu1 %v199_v3 }
  0x47   :  { %188 = vadd.xlane.f32.xlu0 %v187_v10 }
  0x4b   :  { %251 = vadd.xlane.f32.xlu2 %v250_v8 }
  0x4d   :  { %239 = vadd.xlane.f32.xlu1 %v238_v9 }
  0x4f   :  { %248 = vadd.xlane.f32.xlu0 %v247_v11 }
  0x86   :  { %v131_v1 = vpop.xlane.xlu2 %130 }
  0x87   :  { %v164_v27 = vperm.slane %v131_v1, %v546_v13 }
  0x88   :  { %v125_v5 = vpop.xlane.xlu1 %124 }
  0x89   :  { %v157_v25 = vperm.slane %v125_v5, %v553_v19 }
  0x8a   :  { %v119_v12 = vpop.xlane.xlu0 %118 }
  0x8b   :  { %v151_v20 = vperm.slane %v119_v12, %v546_v13 }
  0x8e   :  { %v134_v15 = vpop.xlane.xlu2 %133 }
  0x8f   :  { %v165_v22 = vperm.slane %v134_v15, %v549_v14 }
  0x90   :  { %v128_v16 = vpop.xlane.xlu1 %127 }
  0x91   :  { %v161_v28 = vperm.slane %v128_v16, %v557_v21  ;;  %v166_v33 = vsel %vm154_vm1, %v165_v22, %v164_v27 }
  0x92   :  { %v122_v17 = vpop.xlane.xlu0 %121 }
  0x93   :  { %v153_v18 = vperm.slane %v122_v17, %v549_v14 }
  0x95   :  { %v155_v23 = vsel %vm154_vm1, %v153_v18, %v151_v20 }
  0x96   :  { %v180_v24 = vpop.xlane.xlu2 %179  ;;  %v159_v31 = vsel %vm158_vm2, %v157_v25, %v155_v23  ;;  %v228_v23 = vld [vmem:[#allocation10] sm:$0x3] }
  0x97   :  { %v163_v36 = vsel %vm162_vm3, %v161_v28, %v159_v31  ;;  %v210_v55 = vperm.slane %v180_v24, %v546_v13 }
  0x98   :  { %v140_v26 = vpop.xlane.xlu1 %139 }
  0x99   :  { %v169_v29 = vperm.slane %v140_v26, %v557_v21 }
  0x9a   :  { %v137_v30 = vpop.xlane.xlu0 %136 }
  0x9b   :  { %v167_v32 = vperm.slane %v137_v30, %v553_v19 }
  0x9d   :  { %v168_v34 = vsel %vm158_vm2, %v167_v32, %v166_v33 }
  0x9e   :  { %v170_v37 = vsel %vm162_vm3, %v169_v29, %v168_v34  ;;  %v195_v39 = vpop.xlane.xlu2 %194 }
  0x9f   :  { %v172_v38 = vsel %vm171_vm4, %v170_v37, %v163_v36  ;;  %v218_v49 = vperm.slane %v195_v39, %v549_v14 }
  0xa0   :  { %v174_v40 = vadd.f32 %v172_v38, %v100_v35  ;;  %v192_v41 = vpop.xlane.xlu1 %191 }
  0xa1   :  { %v217_v50 = vperm.slane %v192_v41, %v546_v13 }
  0xa2   :  { %v183_v42 = vpop.xlane.xlu0 %182  ;;  %176 = vst.msk [vmem:[#allocation7] sm:$0x3] %vm64_vm0, %v174_v40 }
  0xa3   :  { %289 = dma.vmem_to_hbm [thread:$0]  %s285_s1, 32, %s287_s29, [#allocation4]   ;;  %v211_v51 = vperm.slane %v183_v42, %v549_v14  ;;  %v219_v57 = vsel %vm154_vm1, %v218_v49, %v217_v50 }
  0xa5   :  { %v212_v60 = vsel %vm154_vm1, %v211_v51, %v210_v55 }
  0xa6   :  { %v231_v43 = vpop.xlane.xlu2 %230 }
  0xa7   :  { %v261_v11 = vperm.slane %v231_v43, %v546_v13 }
  0xa8   :  { %v198_v44 = vpop.xlane.xlu1 %197 }
  0xa9   :  { %v220_v52 = vperm.slane %v198_v44, %v553_v19 }
  0xaa   :  { %v186_v45 = vpop.xlane.xlu0 %185 }
  0xab   :  { %v213_v53 = vperm.slane %v186_v45, %v553_v19  ;;  %v221_v61 = vsel %vm158_vm2, %v220_v52, %v219_v57 }
  0xad   :  { %v214_v63 = vsel %vm158_vm2, %v213_v53, %v212_v60 }
  0xae   :  { %v246_v46 = vpop.xlane.xlu2 %245 }
  0xaf   :  { %v269_v1 = vperm.slane %v246_v46, %v549_v14 }
  0xb0   :  { %v243_v47 = vpop.xlane.xlu1 %242 }
  0xb1   :  { %v268_v0 = vperm.slane %v243_v47, %v546_v13 }
  0xb2   :  { %v234_v48 = vpop.xlane.xlu0 %233 }
  0xb3   :  { %v262_v3 = vperm.slane %v234_v48, %v549_v14  ;;  %v270_v13 = vsel %vm154_vm1, %v269_v1, %v268_v0 }
  0xb5   :  { %v263_v12 = vsel %vm154_vm1, %v262_v3, %v261_v11 }
  0xb6   :  { %v237_v54 = vpop.xlane.xlu2 %236 }
  0xb7   :  { %v264_v8 = vperm.slane %v237_v54, %v553_v19 }
  0xb8   :  { %v201_v56 = vpop.xlane.xlu1 %200 }
  0xb9   :  { %v222_v58 = vperm.slane %v201_v56, %v557_v21  ;;  %v265_v18 = vsel %vm158_vm2, %v264_v8, %v263_v12 }
  0xba   :  { %v189_v59 = vpop.xlane.xlu0 %188 }
  0xbb   :  { %v215_v62 = vperm.slane %v189_v59, %v557_v21  ;;  %v223_v4 = vsel %vm162_vm3, %v222_v58, %v221_v61 }
  0xbd   :  { %v216_v2 = vsel %vm162_vm3, %v215_v62, %v214_v63 }
  0xbe   :  { %v224_v10 = vsel %vm171_vm4, %v223_v4, %v216_v2  ;;  %v252_v5 = vpop.xlane.xlu2 %251 }
  0xbf   :  { %v226_v9 = vadd.f32 %v224_v10, %v177_v7  ;;  %v273_v17 = vperm.slane %v252_v5, %v557_v21 }
  0xc0   :  { %v240_v6 = vpop.xlane.xlu1 %239 }
  0xc1   :  { %227 = vst.msk [vmem:[#allocation8] sm:$0x3] %vm64_vm0, %v226_v9  ;;  %v266_v15 = vperm.slane %v240_v6, %v557_v21 }
  0xc2   :  { %v249_v16 = vpop.xlane.xlu0 %248  ;;  %300 = dma.vmem_to_hbm [thread:$0]  %s296_s30, 32, %s298_s7, [#allocation9]  }
  0xc3   :  { %v271_v20 = vperm.slane %v249_v16, %v553_v19  ;;  %v267_v14 = vsel %vm162_vm3, %v266_v15, %v265_v18 }
  0xc5   :  { %v272_v22 = vsel %vm158_vm2, %v271_v20, %v270_v13 }
  0xc6   :  { %v274_v21 = vsel %vm162_vm3, %v273_v17, %v272_v22 }
  0xc7   :  { %v275_v24 = vsel %vm171_vm4, %v274_v21, %v267_v14 }
  0xc8   :  { %v277_v25 = vadd.f32 %v275_v24, %v228_v23 }
  0xca   :  { %278 = vst.msk [vmem:[#allocation10] sm:$0x3] %vm64_vm0, %v277_v25 }
  0xcb   :  { %311 = dma.vmem_to_hbm [thread:$0]  %s307_s8, 32, %s309_s11, [#allocation9]  }
  0xcc   :  { %460 = dma.done.wait [#allocation4], 32  }
  0xcd   :  { %461 = vsyncadd [#allocation4], 4294967264 }
  0xce   :  { %462 = dma.done.wait [#allocation9], 64  }
  0xcf   :  { %463 = vsyncadd [#allocation9], 4294967232 }
  0xd0   :  { %324 = vsyncpa [#allocation3], 1 }
  0xd1   :  { %325 = vsyncpa [#allocation6], 1 }
  0xd2   :  { %326 = vsyncpa [#allocation4], 1 }
  0xd3   :  { %327 = vsyncpa [#allocation9], 1 }

</bundles_post_ra>
